<compile_context>
chip_gen: v5e
topology: v5e:2x2
jax: 0.10.0
libtpu: 0.0.40
codegen_flags: <defaults>
</compile_context>

<pallas_src>
import math

import jax
import jax.numpy as jnp
from jax.experimental import pallas as pl
from jax.experimental.pallas import tpu as pltpu


def _round_up(x, m):
    return ((x + m - 1) // m) * m


def _pick_tile(dim, candidates):
    """Largest candidate that divides `dim` (dim is a multiple of 128)."""
    for c in candidates:
        if c <= dim and dim % c == 0:
            return c
    return dim


def _vmem_limit(requested_bytes):
    """Generation-aware VMEM limit: 2x estimated need, >=16 MiB, <=75% of cap."""
    cap = 64 * 1024 * 1024
    try:
        cap = int(getattr(pltpu.get_tpu_info(), "vmem_capacity_bytes", cap))
    except Exception:  # interpret mode / AOT on CPU
        pass
    return int(min(max(2 * requested_bytes, 16 * 1024 * 1024), cap * 3 // 4))


# ---------------------------------------------------------------------------
# Kernel 1: support = x @ W
#   (a) single-k fast path: full reduction resident, 2-D grid, no scratch.
#   (b) k-tiled path: 3-D grid, f32 VMEM accumulator, pl.when init/epilogue.
# ---------------------------------------------------------------------------
def _mm_kernel(x_ref, w_ref, o_ref):
    o_ref[...] = jnp.dot(
        x_ref[...], w_ref[...], preferred_element_type=jnp.float32
    ).astype(o_ref.dtype)


def _mm_acc_kernel(x_ref, w_ref, o_ref, acc_ref):
    k = pl.program_id(2)

    @pl.when(k == 0)
    def _():
        acc_ref[...] = jnp.zeros_like(acc_ref)

    acc_ref[...] += jnp.dot(
        x_ref[...], w_ref[...], preferred_element_type=jnp.float32
    )

    @pl.when(k == pl.num_programs(2) - 1)
    def _():
        o_ref[...] = acc_ref[...].astype(o_ref.dtype)


# ---------------------------------------------------------------------------
# Kernel 2: out = adj @ support + bias  (same two variants; bias added once)
# ---------------------------------------------------------------------------
def _agg_bias_kernel(adj_ref, s_ref, b_ref, o_ref):
    o_ref[...] = (
        jnp.dot(adj_ref[...], s_ref[...], preferred_element_type=jnp.float32)
        + b_ref[...]
    ).astype(o_ref.dtype)


def _agg_bias_acc_kernel(adj_ref, s_ref, b_ref, o_ref, acc_ref):
    k = pl.program_id(2)

    @pl.when(k == 0)
    def _():
        acc_ref[...] = jnp.zeros_like(acc_ref)

    acc_ref[...] += jnp.dot(
        adj_ref[...], s_ref[...], preferred_element_type=jnp.float32
    )

    @pl.when(k == pl.num_programs(2) - 1)
    def _():
        o_ref[...] = (acc_ref[...] + b_ref[...]).astype(o_ref.dtype)


# ---------------------------------------------------------------------------
# Wrapper
# ---------------------------------------------------------------------------
def graph_convolution(x, edge_index, weight, bias, edge_attr=None,
                      compute_dtype=jnp.bfloat16):
    """Pallas implementation of GraphConvolution.forward.

    x:          (N, F_in) float32 node features
    edge_index: (2, E)    int32 COO indices
    weight:     (F_in, F_out) float32
    bias:       (F_out,) float32 or None
    edge_attr:  (E,) float32 or None (defaults to ones, as in the module)
    compute_dtype: dtype for matmul inputs (bf16 default, f32 accumulation;
                   pass jnp.float32 for a full-precision parity path).
    """
    n, f_in = x.shape
    f_out = weight.shape[1]
    e = edge_index.shape[1]

    if edge_attr is None:
        edge_attr = jnp.ones((e,), dtype=jnp.float32)

    cdt = jnp.dtype(compute_dtype)
    isz = cdt.itemsize

    # ---- padded / tiled geometry (all dims multiples of 128) --------------
    n_pad = max(128, _round_up(n, 128))
    f_in_pad = _round_up(f_in, 128)
    f_out_pad = _round_up(f_out, 128)

    # Row tile: prefer >=2 parallel row tiles (v7x has 2 TCs sharing the grid).
    tm = 256 if (n_pad >= 512 and n_pad % 256 == 0) else 128
    # Neighbor-reduction tile (kernel 2).  Single step when the graph is small.
    tk = n_pad if n_pad <= 512 else _pick_tile(n_pad, (512, 256, 128))
    # Feature-reduction tile (kernel 1).
    tk_in = f_in_pad if f_in_pad <= 512 else _pick_tile(f_in_pad, (512, 256, 128))
    # Output-column tile: whole padded width (capped) so adj streams once.
    tn = (f_out_pad if f_out_pad <= 2048
          else _pick_tile(f_out_pad, (2048, 1024, 512, 256, 128)))

    # ---- inputs at padded size, directly in compute dtype ------------------
    # Dense adjacency (duplicate COO entries summed, matching
    # torch.sparse_coo_tensor coalescing under spmm).  Built once, no f32
    # scratch buffer / cast pass.
    adj = jnp.zeros((n_pad, n_pad), dtype=cdt)
    adj = adj.at[edge_index[0], edge_index[1]].add(edge_attr.astype(cdt))

    x_p = jnp.zeros((n_pad, f_in_pad), dtype=cdt).at[:n, :f_in].set(x.astype(cdt))
    w_p = jnp.zeros((f_in_pad, f_out_pad), dtype=cdt).at[:f_in, :f_out].set(
        weight.astype(cdt))
    if bias is None:
        b_p = jnp.zeros((1, f_out_pad), dtype=jnp.float32)
    else:
        b_p = jnp.zeros((1, f_out_pad), dtype=jnp.float32).at[0, :f_out].set(
            bias.astype(jnp.float32))

    # ---- kernel 1: support = x @ W -----------------------------------------
    k1_steps = f_in_pad // tk_in
    k1_vmem = (2 * tm * tk_in * isz          # x tile, double-buffered
               + 2 * tk_in * tn * isz        # W tile, double-buffered
               + 2 * tm * tn * isz           # output tile, double-buffered
               + (tm * tn * 4 if k1_steps > 1 else 0))   # f32 accumulator
    k1_cost = pl.CostEstimate(
        flops=2 * n_pad * f_in_pad * f_out_pad,
        transcendentals=0,
        bytes_accessed=(n_pad * f_in_pad + f_in_pad * f_out_pad
                        + n_pad * f_out_pad) * isz)

    if k1_steps == 1:
        support = pl.pallas_call(
            _mm_kernel,
            out_shape=jax.ShapeDtypeStruct((n_pad, f_out_pad), cdt),
            grid_spec=pltpu.PrefetchScalarGridSpec(
                num_scalar_prefetch=0,
                grid=(n_pad // tm, f_out_pad // tn),
                in_specs=[
                    pl.BlockSpec((tm, tk_in), lambda i, j: (i, 0)),
                    pl.BlockSpec((tk_in, tn), lambda i, j: (0, j)),
                ],
                out_specs=pl.BlockSpec((tm, tn), lambda i, j: (i, j)),
            ),
            compiler_params=pltpu.CompilerParams(
                dimension_semantics=("parallel", "parallel"),
                vmem_limit_bytes=_vmem_limit(k1_vmem)),
            cost_estimate=k1_cost,
        )(x_p, w_p)
    else:
        support = pl.pallas_call(
            _mm_acc_kernel,
            out_shape=jax.ShapeDtypeStruct((n_pad, f_out_pad), cdt),
            grid_spec=pltpu.PrefetchScalarGridSpec(
                num_scalar_prefetch=0,
                grid=(n_pad // tm, f_out_pad // tn, k1_steps),
                in_specs=[
                    pl.BlockSpec((tm, tk_in), lambda i, j, k: (i, k)),
                    pl.BlockSpec((tk_in, tn), lambda i, j, k: (k, j)),
                ],
                out_specs=pl.BlockSpec((tm, tn), lambda i, j, k: (i, j)),
                scratch_shapes=[pltpu.VMEM((tm, tn), jnp.float32)],
            ),
            compiler_params=pltpu.CompilerParams(
                dimension_semantics=("parallel", "parallel", "arbitrary"),
                vmem_limit_bytes=_vmem_limit(k1_vmem)),
            cost_estimate=k1_cost,
        )(x_p, w_p)

    # ---- kernel 2: out = adj @ support + bias -------------------------------
    k2_steps = n_pad // tk
    k2_vmem = (2 * tm * tk * isz             # adj tile, double-buffered
               + 2 * tk * tn * isz           # support tile, double-buffered
               + 2 * tn * 4                  # bias row
               + 2 * tm * tn * 4             # f32 output tile, double-buffered
               + (tm * tn * 4 if k2_steps > 1 else 0))   # f32 accumulator
    k2_cost = pl.CostEstimate(
        flops=2 * n_pad * n_pad * f_out_pad,
        transcendentals=0,
        bytes_accessed=((f_out_pad // tn) * n_pad * n_pad * isz
                        + (n_pad // tm) * n_pad * f_out_pad * isz
                        + n_pad * f_out_pad * 4))

    if k2_steps == 1:
        out_pad = pl.pallas_call(
            _agg_bias_kernel,
            out_shape=jax.ShapeDtypeStruct((n_pad, f_out_pad), jnp.float32),
            grid_spec=pltpu.PrefetchScalarGridSpec(
                num_scalar_prefetch=0,
                grid=(n_pad // tm, f_out_pad // tn),
                in_specs=[
                    pl.BlockSpec((tm, tk), lambda i, j: (i, 0)),   # adj
                    pl.BlockSpec((tk, tn), lambda i, j: (0, j)),   # support
                    pl.BlockSpec((1, tn), lambda i, j: (0, j)),    # bias row
                ],
                out_specs=pl.BlockSpec((tm, tn), lambda i, j: (i, j)),
            ),
            compiler_params=pltpu.CompilerParams(
                dimension_semantics=("parallel", "parallel"),
                vmem_limit_bytes=_vmem_limit(k2_vmem)),
            cost_estimate=k2_cost,
        )(adj, support, b_p)
    else:
        out_pad = pl.pallas_call(
            _agg_bias_acc_kernel,
            out_shape=jax.ShapeDtypeStruct((n_pad, f_out_pad), jnp.float32),
            grid_spec=pltpu.PrefetchScalarGridSpec(
                num_scalar_prefetch=0,
                grid=(n_pad // tm, f_out_pad // tn, k2_steps),
                in_specs=[
                    pl.BlockSpec((tm, tk), lambda i, j, k: (i, k)),   # adj
                    pl.BlockSpec((tk, tn), lambda i, j, k: (k, j)),   # support
                    pl.BlockSpec((1, tn), lambda i, j, k: (0, j)),    # bias row
                ],
                out_specs=pl.BlockSpec((tm, tn), lambda i, j, k: (i, j)),
                scratch_shapes=[pltpu.VMEM((tm, tn), jnp.float32)],
            ),
            compiler_params=pltpu.CompilerParams(
                dimension_semantics=("parallel", "parallel", "arbitrary"),
                vmem_limit_bytes=_vmem_limit(k2_vmem)),
            cost_estimate=k2_cost,
        )(adj, support, b_p)

    return out_pad[:n, :f_out]


def init_params(key, in_features, out_features, use_bias=True):
    """Deterministic init mirroring GraphConvolution.reset_parameters."""
    stdv = 1.0 / math.sqrt(out_features)
    weight = jax.random.uniform(
        key, (in_features, out_features), minval=-stdv, maxval=stdv,
        dtype=jnp.float32)
    bias = jnp.zeros((out_features,), dtype=jnp.float32) if use_bias else None
    return weight, bias


def _reference(x, edge_index, weight, bias, edge_attr, compute_dtype):
    """Pure-JAX reference using the same input quantization as the kernel."""
    n = x.shape[0]
    cdt = jnp.dtype(compute_dtype)
    f32 = jnp.float32
    hi = jax.lax.Precision.HIGHEST
    adj = jnp.zeros((n, n), cdt).at[edge_index[0], edge_index[1]].add(
        edge_attr.astype(cdt)).astype(f32)
    xx = x.astype(cdt).astype(f32)
    ww = weight.astype(cdt).astype(f32)
    support = jnp.dot(xx, ww, precision=hi).astype(cdt).astype(f32)
    out = jnp.dot(adj, support, precision=hi)
    if bias is not None:
        out = out + bias.astype(f32)
    return out


if __name__ == "__main__":
    key = jax.random.PRNGKey(0)

    def run_case(key, n, e, f_in, f_out, compute_dtype, use_bias=True):
        k_x, k_src, k_dst, k_attr, k_w, k_b = jax.random.split(key, 6)
        x = jax.random.normal(k_x, (n, f_in), dtype=jnp.float32)
        src = jax.random.randint(k_src, (e,), 0, n, dtype=jnp.int32)
        dst = jax.random.randint(k_dst, (e,), 0, n, dtype=jnp.int32)
        edge_index = jnp.stack([src, dst], axis=0)
        edge_attr = jax.random.uniform(k_attr, (e,), dtype=jnp.float32)
        weight, bias = init_params(k_w, f_in, f_out, use_bias=use_bias)
        if use_bias:
            # Module init zeroes bias; use a random bias to exercise the add.
            bias = jax.random.normal(k_b, (f_out,), dtype=jnp.float32)

        out = graph_convolution(x, edge_index, weight, bias, edge_attr,
                                compute_dtype=compute_dtype)
        out = jax.block_until_ready(out)
        ref = _reference(x, edge_index, weight, bias, edge_attr, compute_dtype)
        assert out.shape == (n, f_out)
        tol = 2e-2 if jnp.dtype(compute_dtype) == jnp.bfloat16 else 1e-2
        assert jnp.allclose(out, ref, atol=tol, rtol=tol), (
            f"mismatch vs reference (N={n}, dtype={compute_dtype})")

    k1, k2, k3, k4 = jax.random.split(key, 4)
    # Small single-tile case: bf16 and f32 compute, with and without bias
    # (exercises both single-k fast-path kernels).
    run_case(k1, n=16, e=48, f_in=32, f_out=64, compute_dtype=jnp.bfloat16)
    run_case(k2, n=16, e=48, f_in=32, f_out=64, compute_dtype=jnp.float32,
             use_bias=False)
    # Padding + multi-tile k-reduction over the adjacency axis (n_pad=640).
    run_case(k3, n=600, e=3000, f_in=45, f_out=70, compute_dtype=jnp.bfloat16)
    # Multi-tile f_in reduction in kernel 1 (f_in_pad=640 -> 5 k steps).
    run_case(k4, n=200, e=800, f_in=600, f_out=96, compute_dtype=jnp.bfloat16)

    print("KERNEL_OK")
</pallas_src>

<mosaic_0001>
module attributes {stable_mosaic.version = 11 : i64} {
  func.func @_mm_kernel(%arg0: i32, %arg1: i32, %arg2: memref<128x128xbf16, #tpu.memory_space<vmem>>, %arg3: memref<128x128xbf16, #tpu.memory_space<vmem>>, %arg4: memref<128x128xbf16, #tpu.memory_space<vmem>>) attributes {dimension_semantics = [#tpu.dimension_semantics<parallel>, #tpu.dimension_semantics<parallel>], iteration_bounds = array<i64: 1, 1>, scalar_prefetch = 0 : i64, scratch_operands = 0 : i64, tpu.core_type = #tpu.core_type<tc>, window_params = [{transform_indices = @transform_0, window_bounds = array<i64: 128, 128>}, {transform_indices = @transform_1, window_bounds = array<i64: 128, 128>}, {transform_indices = @transform_2, window_bounds = array<i64: 128, 128>}]} {
    %c0 = arith.constant 0 : index
    %c0_0 = arith.constant 0 : index
    %0 = vector.load %arg2[%c0, %c0_0] : memref<128x128xbf16, #tpu.memory_space<vmem>>, vector<128x128xbf16>
    %c0_1 = arith.constant 0 : index
    %c0_2 = arith.constant 0 : index
    %1 = vector.load %arg3[%c0_1, %c0_2] : memref<128x128xbf16, #tpu.memory_space<vmem>>, vector<128x128xbf16>
    %cst = arith.constant dense<0.000000e+00> : vector<128x128xf32>
    %2 = tpu.matmul %0, %1, %cst {dimension_numbers = #tpu.dot_dimension_numbers<[1], [0], [0], [1], [0, 0, 1, 1], [], []>} : vector<128x128xbf16>, vector<128x128xbf16>, vector<128x128xf32> -> vector<128x128xf32>
    %3 = arith.truncf %2 : vector<128x128xf32> to vector<128x128xbf16>
    %c0_3 = arith.constant 0 : index
    %c0_4 = arith.constant 0 : index
    %4 = vector.load %arg4[%c0_3, %c0_4] : memref<128x128xbf16, #tpu.memory_space<vmem>>, vector<128x128xbf16>
    tpu.vector_store %arg4[%c0_3, %c0_4], %3 {strides = array<i32>} : memref<128x128xbf16, #tpu.memory_space<vmem>>, vector<128x128xbf16>,
    return
  }
  func.func @transform_0(%arg0: i32, %arg1: i32) -> (i32, i32) {
    %c0_i32 = arith.constant 0 : i32
    %c0_i32_0 = arith.constant 0 : i32
    return %arg0, %c0_i32 : i32, i32
  }
  func.func @transform_1(%arg0: i32, %arg1: i32) -> (i32, i32) {
    %c0_i32 = arith.constant 0 : i32
    %c0_i32_0 = arith.constant 0 : i32
    return %c0_i32, %arg1 : i32, i32
  }
  func.func @transform_2(%arg0: i32, %arg1: i32) -> (i32, i32) {
    %c0_i32 = arith.constant 0 : i32
    return %arg0, %arg1 : i32, i32
  }
}

</mosaic_0001>

<bundles_post_ra>
// kernel: tpu_custom_call.1
= control target key start
LH: loop header
LB: loop body
LE: loop exit
PB: predicated region body
PF: predicated region fallthrough
CT: control target
= control target key end

     0   :  { %7 = vsyncpa [#allocation3], 0  ;;  %s545_s0 = inlined_call_operand.hbm [shape: bf16[128,128], index: 0, kind: input, shape index: {}]   ;;  %s546_s1 = inlined_call_operand.hbm [shape: bf16[128,128], index: 1, kind: input, shape index: {}]   ;;  %s547_s2 = inlined_call_operand.hbm [shape: bf16[128,128], index: 2, kind: output, shape index: {}]  }
   0x1   :  { %8 = vsyncpa [#allocation6], 0 }
   0x2   :  { %9 = vsyncpa [#allocation4], 0  ;;  %s14_s11 = sshll.u32 %s545_s0, 4  ;;  %s507_s12 = smov [#allocation2]   ;;  %s15_s11 = int_to_ptr.hbm [resolvable:$true] %s14_s11 }
   0x3   :  { %s16_s13 = sshll.u32 %s507_s12, 4  ;;  %s27_s16 = sshll.u32 %s546_s1, 4  ;;  %s17_s13 = int_to_ptr.vmem [resolvable:$true] %s16_s13  ;;  %s28_s16 = int_to_ptr.hbm [resolvable:$true] %s27_s16 }
   0x4   :  { %s508_s17 = smov 64   ;;  %s509_s18 = smov 4  }
   0x5   :  { %22 = dma.hbm_to_vmem [thread:$0]  %s15_s11, 1024, %s17_s13, [#allocation3], %s508_s17, %s508_s17, %s509_s18  }
   0x6   :  { %s510_s19 = smov [#allocation5]  }
   0x7   :  { %s29_s20 = sshll.u32 %s510_s19, 4  ;;  %s30_s20 = int_to_ptr.vmem [resolvable:$true] %s29_s20 }
   0x8   :  { %35 = dma.hbm_to_vmem [thread:$0]  %s28_s16, 1024, %s30_s20, [#allocation6], %s508_s17, %s508_s17, %s509_s18  }
   0x9   :  { %501 = dma.done.wait [#allocation3], 1024  }
   0xa   :  { %502 = vsyncadd [#allocation3], 4294966272 }
   0xb   :  { %503 = dma.done.wait [#allocation6], 1024  }
   0xc   :  { %504 = vsyncadd [#allocation6], 4294966272  ;;  %v352_v0 = vld [vmem:[#allocation5 + $0x38] sm:$0xff]  ;;  %v351_v1 = vld [vmem:[#allocation5 + $0x30] sm:$0xff]  ;;  %s511_s0 = smov [#allocation7]   ;;  %s259_s23 = sshll.u32 %s547_s2, 4  ;;  %s260_s23 = int_to_ptr.hbm [resolvable:$true] %s259_s23 }
   0xd   :  { %172 = vmatpush.bf16.msra.mxu0 %v352_v0  ;;  %400 = vmatpush.bf16.msra.mxu1 %v352_v0  ;;  %v350_v2 = vld [vmem:[#allocation5 + $0x28] sm:$0xff]  ;;  %v349_v3 = vld [vmem:[#allocation5 + $0x20] sm:$0xff]  ;;  %v348_v4 = vld [vmem:[#allocation5 + $0x18] sm:$0xff]  ;;  %s257_s1 = sshll.u32 %s511_s0, 4  ;;  %s258_s1 = int_to_ptr.vmem [resolvable:$true] %s257_s1 }
   0xe   :  { %401 = vmatpush.bf16.msra.mxu2 %v352_v0  ;;  %402 = vmatpush.bf16.msra.mxu3 %v352_v0  ;;  %v347_v5 = vld [vmem:[#allocation5 + $0x10] sm:$0xff]  ;;  %v346_v6 = vld [vmem:[#allocation5 + $0x8] sm:$0xff]  ;;  %v345_v7 = vld [vmem:[#allocation5] sm:$0xff] }
   0xf   :  { %v337_v8 = vld [vmem:[#allocation2] sm:$0xff]  ;;  %v339_v9 = vld [vmem:[#allocation2 + $0x10] sm:$0xff]  ;;  %v338_v12 = vld [vmem:[#allocation2 + $0x8] sm:$0xff] }
  0x10   :  { %v341_v10 = vld [vmem:[#allocation2 + $0x20] sm:$0xff]  ;;  %v343_v11 = vld [vmem:[#allocation2 + $0x30] sm:$0xff]  ;;  %v340_v13 = vld [vmem:[#allocation2 + $0x18] sm:$0xff] }
  0x11   :  { %173 = vmatpush.bf16.msra.mxu0 %v351_v1  ;;  %403 = vmatpush.bf16.msra.mxu1 %v351_v1  ;;  %v342_v14 = vld [vmem:[#allocation2 + $0x28] sm:$0xff]  ;;  %v344_v15 = vld [vmem:[#allocation2 + $0x38] sm:$0xff] }
  0x12   :  { %404 = vmatpush.bf16.msra.mxu2 %v351_v1  ;;  %405 = vmatpush.bf16.msra.mxu3 %v351_v1 }
  0x15   :  { %174 = vmatpush.bf16.msra.mxu0 %v350_v2  ;;  %406 = vmatpush.bf16.msra.mxu1 %v350_v2 }
  0x16   :  { %407 = vmatpush.bf16.msra.mxu2 %v350_v2  ;;  %408 = vmatpush.bf16.msra.mxu3 %v350_v2 }
  0x19   :  { %175 = vmatpush.bf16.msra.mxu0 %v349_v3  ;;  %409 = vmatpush.bf16.msra.mxu1 %v349_v3 }
  0x1a   :  { %410 = vmatpush.bf16.msra.mxu2 %v349_v3  ;;  %411 = vmatpush.bf16.msra.mxu3 %v349_v3 }
  0x1d   :  { %176 = vmatpush.bf16.msra.mxu0 %v348_v4  ;;  %412 = vmatpush.bf16.msra.mxu1 %v348_v4 }
  0x1e   :  { %413 = vmatpush.bf16.msra.mxu2 %v348_v4  ;;  %414 = vmatpush.bf16.msra.mxu3 %v348_v4 }
  0x21   :  { %177 = vmatpush.bf16.msra.mxu0 %v347_v5  ;;  %415 = vmatpush.bf16.msra.mxu1 %v347_v5 }
  0x22   :  { %416 = vmatpush.bf16.msra.mxu2 %v347_v5  ;;  %417 = vmatpush.bf16.msra.mxu3 %v347_v5 }
  0x25   :  { %178 = vmatpush.bf16.msra.mxu0 %v346_v6  ;;  %418 = vmatpush.bf16.msra.mxu1 %v346_v6 }
  0x26   :  { %419 = vmatpush.bf16.msra.mxu2 %v346_v6  ;;  %420 = vmatpush.bf16.msra.mxu3 %v346_v6 }
  0x29   :  { %179 = vmatpush.bf16.msra.mxu0 %v345_v7  ;;  %421 = vmatpush.bf16.msra.mxu1 %v345_v7 }
  0x2a   :  { %422 = vmatpush.bf16.msra.mxu2 %v345_v7  ;;  %423 = vmatpush.bf16.msra.mxu3 %v345_v7 }
  0x2c   :  { %180 = vmatmul.bf16.vlgmr.msra.gmra.mxu0 %v337_v8  ;;  %190 = vmatmul.bf16.vlgmr.msra.gmra.mxu1 %v339_v9 }
  0x2d   :  { %200 = vmatmul.bf16.vlgmr.msra.gmra.mxu2 %v341_v10  ;;  %210 = vmatmul.bf16.vlgmr.msra.gmra.mxu3 %v343_v11 }
  0x3c   :  { %185 = vmatmul.bf16.gmra.mxu0 %v338_v12  ;;  %195 = vmatmul.bf16.gmra.mxu1 %v340_v13 }
  0x3d   :  { %205 = vmatmul.bf16.gmra.mxu2 %v342_v14  ;;  %215 = vmatmul.bf16.gmra.mxu3 %v344_v15 }
  0xa9   :  { %v181_v16 = vpop.f32.mrf.mxu0  ;;  %v191_v17 = vpop.f32.mrf.mxu1 }
  0xb0   :  { %v201_v18 = vpop.f32.mrf.mxu2  ;;  %v211_v19 = vpop.f32.mrf.mxu3 }
  0xb1   :  { %v183_v20 = vpop.f32.mrf.mxu0  ;;  %v193_v21 = vpop.f32.mrf.mxu1 }
  0xb2   :  { %v356_v22 = vpack.c.bf16 %v183_v20, %v181_v16  ;;  %v366_v23 = vpack.c.bf16 %v193_v21, %v191_v17 }
  0xb4   :  { %357 = vst [vmem:[#allocation7] sm:$0xff] %v356_v22  }
  0xb5   :  { %394 = vst [vmem:[#allocation7 + $0x10] sm:$0xff] %v366_v23  }
  0xb8   :  { %v203_v24 = vpop.f32.mrf.mxu2  ;;  %v213_v25 = vpop.f32.mrf.mxu3 }
  0xb9   :  { %v376_v26 = vpack.c.bf16 %v203_v24, %v201_v18  ;;  %v386_v27 = vpack.c.bf16 %v213_v25, %v211_v19  ;;  %v186_v28 = vpop.f32.mrf.mxu0  ;;  %v196_v29 = vpop.f32.mrf.mxu1 }
  0xbb   :  { %396 = vst [vmem:[#allocation7 + $0x20] sm:$0xff] %v376_v26  }
  0xbc   :  { %398 = vst [vmem:[#allocation7 + $0x30] sm:$0xff] %v386_v27  }
  0xc0   :  { %v206_v30 = vpop.f32.mrf.mxu2  ;;  %v216_v31 = vpop.f32.mrf.mxu3 }
  0xc1   :  { %v188_v32 = vpop.f32.mrf.mxu0  ;;  %v198_v33 = vpop.f32.mrf.mxu1 }
  0xc2   :  { %v361_v34 = vpack.c.bf16 %v188_v32, %v186_v28  ;;  %v371_v35 = vpack.c.bf16 %v198_v33, %v196_v29 }
  0xc4   :  { %393 = vst [vmem:[#allocation7 + $0x8] sm:$0xff] %v361_v34  }
  0xc5   :  { %395 = vst [vmem:[#allocation7 + $0x18] sm:$0xff] %v371_v35  }
  0xc8   :  { %v208_v36 = vpop.f32.mrf.mxu2  ;;  %v218_v37 = vpop.f32.mrf.mxu3 }
  0xc9   :  { %v381_v38 = vpack.c.bf16 %v208_v36, %v206_v30  ;;  %v391_v39 = vpack.c.bf16 %v218_v37, %v216_v31 }
  0xcb   :  { %397 = vst [vmem:[#allocation7 + $0x28] sm:$0xff] %v381_v38  }
  0xcc   :  { %399 = vst [vmem:[#allocation7 + $0x38] sm:$0xff] %v391_v39  }
  0xcd   :  { %265 = dma.vmem_to_hbm [thread:$0]  %s258_s1, 1024, %s260_s23, [#allocation4], %s508_s17, %s508_s17, %s509_s18  }
  0xce   :  { %505 = dma.done.wait [#allocation4], 1024  }
  0xcf   :  { %506 = vsyncadd [#allocation4], 4294966272 }
  0xd0   :  { %270 = vsyncpa [#allocation3], 1 }
  0xd1   :  { %271 = vsyncpa [#allocation6], 1 }
  0xd2   :  { %272 = vsyncpa [#allocation4], 1 }

</bundles_post_ra>
